<compile_context>
chip_gen: v6e
topology: v6e:2x2x1
jax: 0.10.0
libtpu: 0.0.40
codegen_flags: <defaults>
</compile_context>

<pallas_src>
import functools
import math

import jax
import jax.numpy as jnp
from jax.experimental import pallas as pl
from jax.experimental.pallas import tpu as pltpu

# ---------------- synthetic config (vit_large scaled down) ----------------
PATCH = 14                 # real: 14 (kept)
EMBED_DIM = 128            # real: 1024
NUM_HEADS = 4              # real: 16
HEAD_DIM = EMBED_DIM // NUM_HEADS
MLP_HIDDEN = 4 * EMBED_DIM # mlp_ratio = 4, ffn_layer='mlp'
DEPTH = 6                  # real: 24
OUT_INDEX = [1, 2, 4, 5]   # real: [4, 11, 17, 23]  (4 intermediate layers)
LN_EPS = 1e-6
ATTN_SCALE = HEAD_DIM ** -0.5
NORM_LAYER = False         # module default: final norm NOT applied to outputs

TOKEN_TILE = 16            # token tile (bf16-sublane aligned); use 128 at real scale
PATCH_TILE = 128           # patch-embed M tile
VMEM_LIMIT = 64 * 1024 * 1024

IMAGE_MEAN = jnp.array([0.485, 0.456, 0.406], jnp.float32)
IMAGE_STD = jnp.array([0.229, 0.224, 0.225], jnp.float32)


def _cparams(*sems):
    return pltpu.CompilerParams(dimension_semantics=tuple(sems),
                                vmem_limit_bytes=VMEM_LIMIT)


# ---------------------------- Pallas kernels -------------------------------
def _patch_embed_kernel(cols_ref, mean_ref, istd_ref, w_ref, b_ref, o_ref):
    """(x - mean) / std folded per-column, then im2col-matmul patch embedding."""
    x = (cols_ref[...] - mean_ref[0]) * istd_ref[0]            # f32 (TM, 3*p*p)
    o_ref[...] = (
        jnp.dot(x.astype(jnp.bfloat16), w_ref[...],
                preferred_element_type=jnp.float32) + b_ref[0]
    )


def _layernorm(v, w, b):
    mu = jnp.mean(v, axis=-1, keepdims=True)
    var = jnp.mean((v - mu) ** 2, axis=-1, keepdims=True)
    return (v - mu) * jax.lax.rsqrt(var + LN_EPS) * w + b


def _gelu_exact(x):
    # torch.nn.GELU() default == exact erf formulation (kept for parity)
    return 0.5 * x * (1.0 + jax.lax.erf(x * (1.0 / math.sqrt(2.0))))


def _ln_qkv_kernel(x_ref, ln1w_ref, ln1b_ref, qkvw_ref, qkvb_ref,
                   q_ref, k_ref, v_ref):
    """LN1 + fused QKV projection for one (batch, token-tile)."""
    x = x_ref[0]                                               # (TN, D) f32
    xn = _layernorm(x, ln1w_ref[0], ln1b_ref[0])
    qkv = jnp.dot(xn.astype(jnp.bfloat16), qkvw_ref[...],
                  preferred_element_type=jnp.float32) + qkvb_ref[0]
    # attention scale folded into q once (not per head)
    q_ref[0] = (qkv[:, :EMBED_DIM] * ATTN_SCALE).astype(q_ref.dtype)
    k_ref[0] = qkv[:, EMBED_DIM:2 * EMBED_DIM].astype(k_ref.dtype)
    v_ref[0] = qkv[:, 2 * EMBED_DIM:].astype(v_ref.dtype)


def _attn_core_kernel(q_ref, k_ref, v_ref, o_ref, *, n_valid):
    """Softmax attention for one (batch, head); padded key columns masked.

    A KV-tile / online-softmax axis would be the next step for very long N;
    at vit_large N (~1408 padded) a single (N, N) f32 score tile per head fits.
    """
    qh = q_ref[0, 0]                                           # (Np, hd) bf16 (pre-scaled)
    kh = k_ref[0, 0]
    vh = v_ref[0, 0]
    # contraction over last dims -> no materialized transpose
    s = jax.lax.dot_general(qh, kh, (((1,), (1,)), ((), ())),
                            preferred_element_type=jnp.float32)  # (Np, Np) f32
    n_pad = s.shape[-1]
    col = jax.lax.broadcasted_iota(jnp.int32, (n_pad, n_pad), 1)
    s = jnp.where(col < n_valid, s, -1e30)                     # mask padded keys
    m = jnp.max(s, axis=-1, keepdims=True)
    e = jnp.exp(s - m)
    p = e * pl.reciprocal(jnp.sum(e, axis=-1, keepdims=True), approx=True)
    o = jnp.dot(p.astype(jnp.bfloat16), vh, preferred_element_type=jnp.float32)
    o_ref[0, 0] = o.astype(o_ref.dtype)


def _post_attn_mlp_kernel(x_ref, attn_ref, projw_ref, projb_ref, ls1_ref,
                          ln2w_ref, ln2b_ref, fc1w_ref, fc1b_ref,
                          fc2w_ref, fc2b_ref, ls2_ref, o_ref):
    """x = x + ls1*proj(attn);  x = x + ls2*MLP(LN2(x))   for one token tile."""
    x = x_ref[0]                                               # (TN, D) f32
    proj = jnp.dot(attn_ref[0], projw_ref[...],
                   preferred_element_type=jnp.float32) + projb_ref[0]
    x = x + ls1_ref[0] * proj                                  # LayerScale-1
    xn = _layernorm(x, ln2w_ref[0], ln2b_ref[0])
    h1 = jnp.dot(xn.astype(jnp.bfloat16), fc1w_ref[...],
                 preferred_element_type=jnp.float32) + fc1b_ref[0]
    h1 = _gelu_exact(h1)
    mlp = jnp.dot(h1.astype(jnp.bfloat16), fc2w_ref[...],
                  preferred_element_type=jnp.float32) + fc2b_ref[0]
    o_ref[0] = x + ls2_ref[0] * mlp                            # LayerScale-2


# ------------------------------ wrappers ------------------------------------
def patch_embed(x_img, w_flat, b, mean_cols, istd_cols):
    """Conv2d(3, D, kernel=14, stride=14) as im2col + M-tiled Pallas matmul."""
    B, C, H, W = x_img.shape
    Hp, Wp = H // PATCH, W // PATCH
    cols = x_img.reshape(B, C, Hp, PATCH, Wp, PATCH)
    cols = cols.transpose(0, 2, 4, 1, 3, 5).reshape(B * Hp * Wp, C * PATCH * PATCH)
    M, K = cols.shape
    M_pad = (M + PATCH_TILE - 1) // PATCH_TILE * PATCH_TILE
    cols = jnp.pad(cols, ((0, M_pad - M), (0, 0)))

    out = pl.pallas_call(
        _patch_embed_kernel,
        out_shape=jax.ShapeDtypeStruct((M_pad, EMBED_DIM), jnp.float32),
        grid=(M_pad // PATCH_TILE,),
        in_specs=[
            pl.BlockSpec((PATCH_TILE, K), lambda i: (i, 0)),
            pl.BlockSpec((1, K), lambda i: (0, 0)),
            pl.BlockSpec((1, K), lambda i: (0, 0)),
            pl.BlockSpec((K, EMBED_DIM), lambda i: (0, 0)),
            pl.BlockSpec((1, EMBED_DIM), lambda i: (0, 0)),
        ],
        out_specs=pl.BlockSpec((PATCH_TILE, EMBED_DIM), lambda i: (i, 0)),
        compiler_params=_cparams("parallel"),
    )(cols, mean_cols, istd_cols, w_flat, b)
    return out[:M].reshape(B, Hp * Wp, EMBED_DIM)


def transformer_block(x, blk, n_valid):
    """One DINOv2 block: x = x + ls1*Attn(LN1(x)); x = x + ls2*MLP(LN2(x))."""
    B, N_pad, D = x.shape
    Hh = MLP_HIDDEN
    TN = TOKEN_TILE
    n_tok = N_pad // TN
    (ln1w, ln1b, qkvw, qkvb, projw, projb, ls1,
     ln2w, ln2b, fc1w, fc1b, fc2w, fc2b, ls2) = blk

    tok_spec = pl.BlockSpec((1, TN, D), lambda b, t: (b, t, 0))

    def full(r, c):
        return pl.BlockSpec((r, c), lambda b, t: (0, 0))

    # --- 1) LN1 + fused QKV projection (token-tiled) ---
    q, k, v = pl.pallas_call(
        _ln_qkv_kernel,
        out_shape=tuple(jax.ShapeDtypeStruct((B, N_pad, D), jnp.bfloat16)
                        for _ in range(3)),
        grid=(B, n_tok),
        in_specs=[
            tok_spec,                       # x (f32 residual stream)
            full(1, D), full(1, D),         # ln1 w, b
            full(D, 3 * D), full(1, 3 * D), # qkv w (bf16), b
        ],
        out_specs=[tok_spec, tok_spec, tok_spec],
        compiler_params=_cparams("parallel", "parallel"),
    )(x, ln1w, ln1b, qkvw, qkvb)

    # glue: split heads -> (B, nh, N_pad, hd)
    def to_heads(t):
        return t.reshape(B, N_pad, NUM_HEADS, HEAD_DIM).transpose(0, 2, 1, 3)

    qh, kh, vh = to_heads(q), to_heads(k), to_heads(v)

    # --- 2) per-(batch, head) softmax attention ---
    head_spec = pl.BlockSpec((1, 1, N_pad, HEAD_DIM), lambda b, h: (b, h, 0, 0))
    attn_heads = pl.pallas_call(
        functools.partial(_attn_core_kernel, n_valid=n_valid),
        out_shape=jax.ShapeDtypeStruct((B, NUM_HEADS, N_pad, HEAD_DIM),
                                       jnp.bfloat16),
        grid=(B, NUM_HEADS),
        in_specs=[head_spec, head_spec, head_spec],
        out_specs=head_spec,
        compiler_params=_cparams("parallel", "parallel"),
    )(qh, kh, vh)

    # glue: merge heads back to (B, N_pad, D) (lane-packed, bf16 proj operand)
    attn = attn_heads.transpose(0, 2, 1, 3).reshape(B, N_pad, D)

    # --- 3) proj + LS1 residual + LN2 + MLP + LS2 residual (token-tiled) ---
    # TODO(synk): cross-pallas_call weight-prefetch futures (start next block's
    # weight DMA during this block's compute) are not implemented here.
    out = pl.pallas_call(
        _post_attn_mlp_kernel,
        out_shape=jax.ShapeDtypeStruct((B, N_pad, D), jnp.float32),
        grid=(B, n_tok),
        in_specs=[
            tok_spec,                       # x (f32 residual stream)
            tok_spec,                       # attn (bf16)
            full(D, D), full(1, D),         # proj w (bf16), b
            full(1, D),                     # layerscale-1 gamma
            full(1, D), full(1, D),         # ln2 w, b
            full(D, Hh), full(1, Hh),       # fc1 w (bf16), b
            full(Hh, D), full(1, D),        # fc2 w (bf16), b
            full(1, D),                     # layerscale-2 gamma
        ],
        out_specs=tok_spec,
        compiler_params=_cparams("parallel", "parallel"),
    )(x, attn, projw, projb, ls1, ln2w, ln2b, fc1w, fc1b, fc2w, fc2b, ls2)
    return out


# ------------------------- parameter construction ---------------------------
def init_params(key, num_patches):
    D, Hh, K = EMBED_DIM, MLP_HIDDEN, 3 * PATCH * PATCH
    keys = jax.random.split(key, 3 + 4 * DEPTH)
    it = iter(range(len(keys)))

    def nrm(shape, dtype=jnp.float32, s=0.02):
        return (s * jax.random.normal(keys[next(it)], shape)).astype(dtype)

    params = {
        "patch_w": nrm((K, D), jnp.bfloat16),       # conv weight reshaped (C*p*p, D)
        "patch_b": jnp.zeros((1, D), jnp.float32),
        "cls_token": nrm((1, 1, D)),
        # TODO(synk): bicubic interpolation of the native 37x37 DINOv2 pos-embed
        # grid (interpolate_pos_encoding, interpolate_offset=0.1) is omitted;
        # the synthetic pos_embed is created directly at the target grid size.
        "pos_embed": nrm((1, 1 + num_patches, D)),
        "blocks": [],
    }
    for _ in range(DEPTH):
        blk = (
            jnp.ones((1, D), jnp.float32), jnp.zeros((1, D), jnp.float32),     # ln1
            nrm((D, 3 * D), jnp.bfloat16), jnp.zeros((1, 3 * D), jnp.float32), # qkv
            nrm((D, D), jnp.bfloat16), jnp.zeros((1, D), jnp.float32),         # proj
            jnp.ones((1, D), jnp.float32),                                     # ls1 gamma (init_values=1.0)
            jnp.ones((1, D), jnp.float32), jnp.zeros((1, D), jnp.float32),     # ln2
            nrm((D, Hh), jnp.bfloat16), jnp.zeros((1, Hh), jnp.float32),       # fc1
            nrm((Hh, D), jnp.bfloat16), jnp.zeros((1, D), jnp.float32),        # fc2
            jnp.ones((1, D), jnp.float32),                                     # ls2 gamma
        )
        params["blocks"].append(blk)
    return params


# ------------------------------- forward ------------------------------------
def dinov2_forward(x_img, params):
    """Mirrors DINOv2.forward: returns {'outputs': [...], 'class_tokens': [...]}."""
    B, C, H, W = x_img.shape
    Hp, Wp = H // PATCH, W // PATCH
    Np = Hp * Wp
    N = 1 + Np
    N_pad = (N + TOKEN_TILE - 1) // TOKEN_TILE * TOKEN_TILE

    mean_cols = jnp.repeat(IMAGE_MEAN, PATCH * PATCH)[None, :]        # (1, 3*p*p)
    istd_cols = (1.0 / jnp.repeat(IMAGE_STD, PATCH * PATCH))[None, :]

    # (x - mean)/std + patch embed (Pallas, M-tiled)
    tok = patch_embed(x_img, params["patch_w"], params["patch_b"],
                      mean_cols, istd_cols)                           # (B, Np, D)

    # prepare_tokens_with_masks: cls concat + positional embedding (glue),
    # then pad tokens to a layout-friendly count (padded keys masked in attn).
    cls = jnp.broadcast_to(params["cls_token"], (B, 1, EMBED_DIM))
    x = jnp.concatenate([cls, tok], axis=1) + params["pos_embed"]     # (B, N, D)
    x = jnp.pad(x, ((0, 0), (0, N_pad - N), (0, 0)))                  # (B, N_pad, D)

    outputs = []
    for i in range(DEPTH):
        x = transformer_block(x, params["blocks"][i], N)
        if i in OUT_INDEX:
            outputs.append(x)

    # norm_layer=False (module default) -> final LayerNorm not applied.
    class_tokens = [o[:, 0] for o in outputs]                                  # (B, D)
    feats = [
        o[:, 1:N].reshape(B, Hp, Wp, EMBED_DIM).transpose(0, 3, 1, 2)          # (B, D, Hp, Wp)
        for o in outputs
    ]
    return {"outputs": feats, "class_tokens": class_tokens}


# --------------------------------- main --------------------------------------
if __name__ == "__main__":
    B, H, W = 2, 56, 56                       # H, W must be multiples of 14
    Hp, Wp = H // PATCH, W // PATCH
    key = jax.random.PRNGKey(0)
    k_img, k_par = jax.random.split(key)

    x = jax.random.uniform(k_img, (B, 3, H, W), jnp.float32)
    params = init_params(k_par, Hp * Wp)

    out = dinov2_forward(x, params)
    jax.block_until_ready(out)

    assert len(out["outputs"]) == 4 and len(out["class_tokens"]) == 4
    assert all(o.shape == (B, EMBED_DIM, Hp, Wp) for o in out["outputs"])
    assert all(c.shape == (B, EMBED_DIM) for c in out["class_tokens"])
    assert all(bool(jnp.all(jnp.isfinite(o))) for o in out["outputs"])
    print("KERNEL_OK")
</pallas_src>

<mosaic_0001>
module attributes {stable_mosaic.version = 11 : i64} {
  func.func @_patch_embed_kernel(%arg0: i32, %arg1: memref<128x588xf32, #tpu.memory_space<vmem>>, %arg2: memref<1x588xf32, #tpu.memory_space<vmem>>, %arg3: memref<1x588xf32, #tpu.memory_space<vmem>>, %arg4: memref<588x128xbf16, #tpu.memory_space<vmem>>, %arg5: memref<1x128xf32, #tpu.memory_space<vmem>>, %arg6: memref<128x128xf32, #tpu.memory_space<vmem>>) attributes {dimension_semantics = [#tpu.dimension_semantics<parallel>], iteration_bounds = array<i64: 1>, scalar_prefetch = 0 : i64, scratch_operands = 0 : i64, tpu.core_type = #tpu.core_type<tc>, window_params = [{transform_indices = @transform_0, window_bounds = array<i64: 128, 588>}, {pipeline_mode = #tpu.pipeline_mode<synchronous>, transform_indices = @transform_1, window_bounds = array<i64: 1, 588>}, {pipeline_mode = #tpu.pipeline_mode<synchronous>, transform_indices = @transform_2, window_bounds = array<i64: 1, 588>}, {pipeline_mode = #tpu.pipeline_mode<synchronous>, transform_indices = @transform_3, window_bounds = array<i64: 588, 128>}, {pipeline_mode = #tpu.pipeline_mode<synchronous>, transform_indices = @transform_4, window_bounds = array<i64: 1, 128>}, {transform_indices = @transform_5, window_bounds = array<i64: 128, 128>}]} {
    %c0 = arith.constant 0 : index
    %c0_0 = arith.constant 0 : index
    %0 = vector.load %arg1[%c0, %c0_0] : memref<128x588xf32, #tpu.memory_space<vmem>>, vector<128x588xf32>
    %c0_1 = arith.constant 0 : index
    %c0_2 = arith.constant 0 : index
    %1 = vector.load %arg2[%c0_1, %c0_2] : memref<1x588xf32, #tpu.memory_space<vmem>>, vector<1x588xf32>
    %2 = vector.shape_cast %1 : vector<1x588xf32> to vector<588xf32>
    %3 = vector.shape_cast %2 : vector<588xf32> to vector<1x588xf32>
    %4 = vector.broadcast %3 : vector<1x588xf32> to vector<128x588xf32>
    %5 = arith.subf %0, %4 : vector<128x588xf32>
    %c0_3 = arith.constant 0 : index
    %c0_4 = arith.constant 0 : index
    %6 = vector.load %arg3[%c0_3, %c0_4] : memref<1x588xf32, #tpu.memory_space<vmem>>, vector<1x588xf32>
    %7 = vector.shape_cast %6 : vector<1x588xf32> to vector<588xf32>
    %8 = vector.shape_cast %7 : vector<588xf32> to vector<1x588xf32>
    %9 = vector.broadcast %8 : vector<1x588xf32> to vector<128x588xf32>
    %10 = arith.mulf %5, %9 : vector<128x588xf32>
    %11 = arith.truncf %10 : vector<128x588xf32> to vector<128x588xbf16>
    %c0_5 = arith.constant 0 : index
    %c0_6 = arith.constant 0 : index
    %12 = vector.load %arg4[%c0_5, %c0_6] : memref<588x128xbf16, #tpu.memory_space<vmem>>, vector<588x128xbf16>
    %cst = arith.constant dense<0.000000e+00> : vector<128x128xf32>
    %13 = tpu.matmul %11, %12, %cst {dimension_numbers = #tpu.dot_dimension_numbers<[1], [0], [0], [1], [0, 0, 1, 1], [], []>} : vector<128x588xbf16>, vector<588x128xbf16>, vector<128x128xf32> -> vector<128x128xf32>
    %c0_7 = arith.constant 0 : index
    %c0_8 = arith.constant 0 : index
    %14 = vector.load %arg5[%c0_7, %c0_8] : memref<1x128xf32, #tpu.memory_space<vmem>>, vector<1x128xf32>
    %15 = vector.shape_cast %14 : vector<1x128xf32> to vector<128xf32>
    %16 = vector.shape_cast %15 : vector<128xf32> to vector<1x128xf32>
    %17 = vector.broadcast %16 : vector<1x128xf32> to vector<128x128xf32>
    %18 = arith.addf %13, %17 : vector<128x128xf32>
    %c0_9 = arith.constant 0 : index
    %c0_10 = arith.constant 0 : index
    %19 = vector.load %arg6[%c0_9, %c0_10] : memref<128x128xf32, #tpu.memory_space<vmem>>, vector<128x128xf32>
    tpu.vector_store %arg6[%c0_9, %c0_10], %18 {strides = array<i32>} : memref<128x128xf32, #tpu.memory_space<vmem>>, vector<128x128xf32>,
    return
  }
  func.func @transform_0(%arg0: i32) -> (i32, i32) {
    %c0_i32 = arith.constant 0 : i32
    %c0_i32_0 = arith.constant 0 : i32
    return %arg0, %c0_i32 : i32, i32
  }
  func.func @transform_1(%arg0: i32) -> (i32, i32) {
    %c0_i32 = arith.constant 0 : i32
    %c0_i32_0 = arith.constant 0 : i32
    %c0_i32_1 = arith.constant 0 : i32
    return %c0_i32, %c0_i32_0 : i32, i32
  }
  func.func @transform_2(%arg0: i32) -> (i32, i32) {
    %c0_i32 = arith.constant 0 : i32
    %c0_i32_0 = arith.constant 0 : i32
    %c0_i32_1 = arith.constant 0 : i32
    return %c0_i32, %c0_i32_0 : i32, i32
  }
  func.func @transform_3(%arg0: i32) -> (i32, i32) {
    %c0_i32 = arith.constant 0 : i32
    %c0_i32_0 = arith.constant 0 : i32
    %c0_i32_1 = arith.constant 0 : i32
    return %c0_i32, %c0_i32_0 : i32, i32
  }
  func.func @transform_4(%arg0: i32) -> (i32, i32) {
    %c0_i32 = arith.constant 0 : i32
    %c0_i32_0 = arith.constant 0 : i32
    %c0_i32_1 = arith.constant 0 : i32
    return %c0_i32, %c0_i32_0 : i32, i32
  }
  func.func @transform_5(%arg0: i32) -> (i32, i32) {
    %c0_i32 = arith.constant 0 : i32
    %c0_i32_0 = arith.constant 0 : i32
    return %arg0, %c0_i32 : i32, i32
  }
}

</mosaic_0001>

<bundles_post_ra>
// kernel: tpu_custom_call.1
= control target key start
LH: loop header
LB: loop body
LE: loop exit
PB: predicated region body
PF: predicated region fallthrough
CT: control target
= control target key end

     0   :  { %v104_v19 = vlaneseq  ;;  %vm683_vm0 = vcmask 1045504   ;;  %s2013_s0 = inlined_call_operand.vmem [shape: f32[128,588], index: 0, kind: input, shape index: {}]   ;;  %s2014_s1 = inlined_call_operand.vmem [shape: f32[1,588], index: 1, kind: input, shape index: {}]   ;;  %s2015_s2 = inlined_call_operand.vmem [shape: f32[1,588], index: 2, kind: input, shape index: {}]   ;;  %s2016_s3 = inlined_call_operand.vmem [shape: bf16[588,128], index: 3, kind: input, shape index: {}]   ;;  %s2017_s4 = inlined_call_operand.vmem [shape: f32[1,128], index: 4, kind: input, shape index: {}]   ;;  %s2018_s5 = inlined_call_operand.hbm [shape: f32[128,128], index: 5, kind: output, shape index: {}]  }
   0x1   :  { %v1238_v0 = vld [vmem:[%s2016_s3 + $0x78] sm:$0xff]   ;;  %v1242_v4 = vld [vmem:[%s2016_s3 + $0x70] sm:$0xff]   ;;  %v1246_v8 = vld [vmem:[%s2016_s3 + $0x68] sm:$0xff]  }
   0x2   :  { %v1239_v1 = vld [vmem:[%s2016_s3 + $0xf8] sm:$0xff]   ;;  %1056 = vmatprep.subr.bf16.mxu0 %v1238_v0  ;;  %v1243_v5 = vld [vmem:[%s2016_s3 + $0xf0] sm:$0xff]   ;;  %v1247_v9 = vld [vmem:[%s2016_s3 + $0xe8] sm:$0xff]   ;;  %v1399_v24 = vshrl.u32 %v104_v19, 7 }
   0x3   :  { %v1240_v2 = vld [vmem:[%s2016_s3 + $0x38] sm:$0xff]   ;;  %1120 = vmatprep.subr.bf16.mxu1 %v1239_v1  ;;  %v1244_v6 = vld [vmem:[%s2016_s3 + $0x30] sm:$0xff]   ;;  %v1248_v10 = vld [vmem:[%s2016_s3 + $0x28] sm:$0xff]  }
   0x4   :  { %v1241_v3 = vld [vmem:[%s2016_s3 + $0xb8] sm:$0xff]   ;;  %1057 = vmatpush3.bf16.msra.mxu0 %v1240_v2  ;;  %v1245_v7 = vld [vmem:[%s2016_s3 + $0xb0] sm:$0xff]   ;;  %v1249_v11 = vld [vmem:[%s2016_s3 + $0xa8] sm:$0xff]   ;;  %v110_v29 = vsub.s32 1, %v1399_v24  ;;  %v118_v31 = vsub.s32 3, %v1399_v24  ;;  %v106_v33 = vsub.s32 0, %v1399_v24 }
   0x5   :  { %1121 = vmatpush3.bf16.msra.mxu1 %v1241_v3  ;;  %1058 = vmatprep.subr.bf16.mxu0 %v1242_v4  ;;  %v1250_v12 = vld [vmem:[%s2016_s3 + $0x60] sm:$0xff]   ;;  %v1254_v16 = vld [vmem:[%s2016_s3 + $0x58] sm:$0xff]   ;;  %v1258_v21 = vld [vmem:[%s2016_s3 + $0x50] sm:$0xff]   ;;  %v114_v35 = vsub.s32 2, %v1399_v24 }
   0x6   :  { %1122 = vmatprep.subr.bf16.mxu1 %v1243_v5  ;;  %v1251_v13 = vld [vmem:[%s2016_s3 + $0xe0] sm:$0xff]   ;;  %v1255_v17 = vld [vmem:[%s2016_s3 + $0xd8] sm:$0xff]   ;;  %v1259_v22 = vld [vmem:[%s2016_s3 + $0xd0] sm:$0xff]  }
   0x7   :  { %v1252_v14 = vld [vmem:[%s2016_s3 + $0x20] sm:$0xff]   ;;  %v1256_v18 = vld [vmem:[%s2016_s3 + $0x18] sm:$0xff]   ;;  %v1260_v23 = vld [vmem:[%s2016_s3 + $0x10] sm:$0xff]  }
   0x8   :  { %1059 = vmatpush3.bf16.msra.mxu0 %v1244_v6  ;;  %v1253_v15 = vld [vmem:[%s2016_s3 + $0xa0] sm:$0xff]   ;;  %v1257_v20 = vld [vmem:[%s2016_s3 + $0x98] sm:$0xff]   ;;  %v1261_v25 = vld [vmem:[%s2016_s3 + $0x90] sm:$0xff]  }
   0x9   :  { %1123 = vmatpush3.bf16.msra.mxu1 %v1245_v7  ;;  %1060 = vmatprep.subr.bf16.mxu0 %v1246_v8  ;;  %v1262_v26 = vld [vmem:[%s2016_s3 + $0x48] sm:$0xff]   ;;  %v1266_v32 = vld [vmem:[%s2016_s3 + $0x40] sm:$0xff]   ;;  %v28_v39 = vld [vmem:[%s2013_s0 + $0x30] sm:$0xff] }
   0xa   :  { %1124 = vmatprep.subr.bf16.mxu1 %v1247_v9  ;;  %v1263_v27 = vld [vmem:[%s2016_s3 + $0xc8] sm:$0xff]   ;;  %v1267_v34 = vld [vmem:[%s2016_s3 + $0xc0] sm:$0xff]   ;;  %v25_v43 = vld [vmem:[%s2013_s0 + $0x18] sm:$0xff] }
   0xb   :  { %v1264_v28 = vld [vmem:[%s2016_s3 + $0x8] sm:$0xff]   ;;  %v1268_v36 = vld [vmem:[%s2016_s3] sm:$0xff]   ;;  %v24_v53 = vld [vmem:[%s2013_s0 + $0x10] sm:$0xff] }
   0xc   :  { %1061 = vmatpush3.bf16.msra.mxu0 %v1248_v10  ;;  %v1265_v30 = vld [vmem:[%s2016_s3 + $0x88] sm:$0xff]   ;;  %v1269_v37 = vld [vmem:[%s2016_s3 + $0x80] sm:$0xff]   ;;  %v29_v59 = vld [vmem:[%s2013_s0 + $0x38] sm:$0xff] }
   0xd   :  { %1125 = vmatpush3.bf16.msra.mxu1 %v1249_v11  ;;  %1062 = vmatprep.subr.bf16.mxu0 %v1250_v12  ;;  %v23_v38 = vld [vmem:[%s2013_s0 + $0x8] sm:$0xff]  ;;  %v1441_v40 = vld [vmem:[%s2014_s1] sm:$0x1f]  ;;  %v33_v1 = vld [vmem:[%s2013_s0 + $0x58] sm:$0xff] }
   0xe   :  { %1126 = vmatprep.subr.bf16.mxu1 %v1251_v13  ;;  %v1444_v41 = vrot.slane %v1441_v40, %v110_v29  ;;  %v1449_v42 = vld [vmem:[%s2015_s2] sm:$0x1f]  ;;  %v1458_v45 = vrot.slane %v1441_v40, %v118_v31  ;;  %v1461_v46 = vrot.slane %v1441_v40, %v106_v33  ;;  %v1464_v47 = vrot.slane %v1441_v40, %v114_v35  ;;  %v27_v51 = vld [vmem:[%s2013_s0 + $0x28] sm:$0xff]  ;;  %v40_v12 = vld [vmem:[%s2013_s0 + $0x90] sm:$0xff] }
   0xf   :  { %v30_v44 = vld [vmem:[%s2013_s0 + $0x40] sm:$0xff]  ;;  %v1467_v48 = vrot.slane %v1449_v42, %v110_v29  ;;  %v1470_v49 = vrot.slane %v1449_v42, %v118_v31  ;;  %v1479_v52 = vrot.slane %v1449_v42, %v106_v33  ;;  %v1485_v54 = vrot.slane %v1449_v42, %v114_v35  ;;  %v35_v7 = vld [vmem:[%s2013_s0 + $0x68] sm:$0xff]  ;;  %v32_v13 = vld [vmem:[%s2013_s0 + $0x50] sm:$0xff] }
  0x10   :  { %1063 = vmatpush3.bf16.msra.mxu0 %v1252_v14  ;;  %v22_v50 = vld [vmem:[%s2013_s0] sm:$0xff]  ;;  %v130_v55 = vsub.f32 %v23_v38, %v1444_v41  ;;  %v135_v56 = vsub.f32 %v28_v39, %v1444_v41  ;;  %v132_v57 = vsub.f32 %v25_v43, %v1458_v45  ;;  %v137_v58 = vsub.f32 %v30_v44, %v1458_v45  ;;  %v39_v29 = vld [vmem:[%s2013_s0 + $0x88] sm:$0xff]  ;;  %v45_v38 = vld [vmem:[%s2013_s0 + $0xb8] sm:$0xff] }
  0x11   :  { %1127 = vmatpush3.bf16.msra.mxu1 %v1253_v15  ;;  %1064 = vmatprep.subr.bf16.mxu0 %v1254_v16  ;;  %v129_v60 = vsub.f32 %v22_v50, %v1461_v46  ;;  %v134_v61 = vsub.f32 %v27_v51, %v1461_v46  ;;  %v131_v62 = vsub.f32 %v24_v53, %v1464_v47  ;;  %v1270_v0 = vld [vmem:[%s2016_s3 + $0x120] sm:$0x3f]   ;;  %v43_v33 = vld [vmem:[%s2013_s0 + $0xa8] sm:$0xff] }
  0x12   :  { %1128 = vmatprep.subr.bf16.mxu1 %v1255_v17  ;;  %v136_v63 = vsub.f32 %v29_v59, %v1464_v47  ;;  %v237_v2 = vmul.f32 %v1467_v48, %v130_v55  ;;  %v242_v3 = vmul.f32 %v1467_v48, %v135_v56  ;;  %v239_v4 = vmul.f32 %v1470_v49, %v132_v57  ;;  %v38_v6 = vld [vmem:[%s2013_s0 + $0x80] sm:$0xff] }
  0x13   :  { %v244_v5 = vmul.f32 %v1470_v49, %v137_v58  ;;  %v236_v8 = vmul.f32 %v1479_v52, %v129_v60  ;;  %v241_v9 = vmul.f32 %v1479_v52, %v134_v61  ;;  %v238_v10 = vmul.f32 %v1485_v54, %v131_v62  ;;  %v50_v39 = vld [vmem:[%s2013_s0 + $0xe0] sm:$0xff]  ;;  %v47_v58 = vld [vmem:[%s2013_s0 + $0xc8] sm:$0xff] }
  0x14   :  { %1065 = vmatpush3.bf16.msra.mxu0 %v1256_v18  ;;  %v243_v11 = vmul.f32 %v1485_v54, %v136_v63  ;;  %v317_v14 = vpack.c.bf16 %v242_v3, %v237_v2  ;;  %v685_v16 = vsel %vm683_vm0, %v1270_v0, 0  ;;  %v140_v17 = vsub.f32 %v33_v1, %v1444_v41  ;;  %v37_v18 = vld [vmem:[%s2013_s0 + $0x78] sm:$0xff]  ;;  %v42_v51 = vld [vmem:[%s2013_s0 + $0xa0] sm:$0xff]  ;;  %v44_v63 = vld [vmem:[%s2013_s0 + $0xb0] sm:$0xff] }
  0x15   :  { %1129 = vmatpush3.bf16.msra.mxu1 %v1257_v20  ;;  %1066 = vmatprep.subr.bf16.mxu0 %v1258_v21  ;;  %v319_v15 = vpack.c.bf16 %v244_v5, %v239_v4  ;;  %v316_v19 = vpack.c.bf16 %v241_v9, %v236_v8  ;;  %v145_v21 = vsub.f32 %v38_v6, %v1444_v41  ;;  %v1272_v1 = vld [vmem:[%s2016_s3 + $0x110] sm:$0xff]   ;;  %v53_v5 = vld [vmem:[%s2013_s0 + $0xf8] sm:$0xff] }
  0x16   :  { %1130 = vmatprep.subr.bf16.mxu1 %v1259_v22  ;;  %v318_v20 = vpack.c.bf16 %v243_v11, %v238_v10  ;;  %v142_v22 = vsub.f32 %v35_v7, %v1458_v45  ;;  %719 = vmatprep.mubr.bf16.mxu0 %v317_v14  ;;  %v146_v50 = vsub.f32 %v39_v29, %v1464_v47  ;;  %v58_v10 = vld [vmem:[%s2013_s0 + $0x120] sm:$0xff]  ;;  %v55_v11 = vld [vmem:[%s2013_s0 + $0x108] sm:$0xff] }
  0x17   :  { %816 = vmatprep.mubr.bf16.mxu1 %v319_v15  ;;  %v150_v56 = vsub.f32 %v43_v33, %v1444_v41  ;;  %v152_v61 = vsub.f32 %v45_v38, %v1458_v45  ;;  %v157_v62 = vsub.f32 %v50_v39, %v1458_v45  ;;  %v149_v4 = vsub.f32 %v42_v51, %v1461_v46  ;;  %v68_v33 = vld [vmem:[%s2013_s0 + $0x170] sm:$0xff]  ;;  %v65_v39 = vld [vmem:[%s2013_s0 + $0x158] sm:$0xff] }
  0x18   :  { %1067 = vmatpush3.bf16.msra.mxu0 %v1260_v23  ;;  %v34_v23 = vld [vmem:[%s2013_s0 + $0x60] sm:$0xff]  ;;  %v249_v31 = vmul.f32 %v1470_v49, %v142_v22  ;;  %v253_v60 = vmul.f32 %v1485_v54, %v146_v50  ;;  %v154_v9 = vsub.f32 %v47_v58, %v1461_v46  ;;  %v151_v14 = vsub.f32 %v44_v63, %v1464_v47 }
  0x19   :  { %1131 = vmatpush3.bf16.msra.mxu1 %v1261_v25  ;;  %1068 = vmatprep.subr.bf16.mxu0 %v1262_v26  ;;  %v1271_v25 = vld [vmem:[%s2016_s3 + $0x118] sm:$0xff]   ;;  %v247_v26 = vmul.f32 %v1467_v48, %v140_v17  ;;  %v257_v2 = vmul.f32 %v1467_v48, %v150_v56  ;;  %v259_v7 = vmul.f32 %v1470_v49, %v152_v61  ;;  %v52_v17 = vld [vmem:[%s2013_s0 + $0xf0] sm:$0xff] }
  0x1a   :  { %1132 = vmatprep.subr.bf16.mxu1 %v1263_v27  ;;  %v147_v27 = vsub.f32 %v40_v12, %v1458_v45  ;;  %v264_v8 = vmul.f32 %v1470_v49, %v157_v62  ;;  %v258_v22 = vmul.f32 %v1485_v54, %v151_v14 }
  0x1c   :  { %1069 = vmatpush3.bf16.msra.mxu0 %v1264_v28  ;;  %v139_v28 = vsub.f32 %v32_v13, %v1461_v46  ;;  %v254_v35 = vmul.f32 %v1470_v49, %v147_v27  ;;  %v256_v13 = vmul.f32 %v1479_v52, %v149_v4  ;;  %v54_v27 = vld [vmem:[%s2013_s0 + $0x100] sm:$0xff]  ;;  %v67_v4 = vld [vmem:[%s2013_s0 + $0x168] sm:$0xff] }
  0x1d   :  { %1133 = vmatpush3.bf16.msra.mxu1 %v1265_v30  ;;  %1070 = vmatprep.subr.bf16.mxu0 %v1266_v32  ;;  %v252_v30 = vmul.f32 %v1467_v48, %v145_v21  ;;  %v144_v32 = vsub.f32 %v37_v18, %v1461_v46  ;;  %v329_v18 = vpack.c.bf16 %v264_v8, %v259_v7  ;;  %v57_v21 = vld [vmem:[%s2013_s0 + $0x118] sm:$0xff]  ;;  %v64_v8 = vld [vmem:[%s2013_s0 + $0x150] sm:$0xff] }
  0x1e   :  { %1134 = vmatprep.subr.bf16.mxu1 %v1267_v34  ;;  %v48_v34 = vld [vmem:[%s2013_s0 + $0xd0] sm:$0xff]  ;;  %v324_v53 = vpack.c.bf16 %v254_v35, %v249_v31  ;;  %v159_v31 = vsub.f32 %v52_v17, %v1461_v46  ;;  %v164_v38 = vsub.f32 %v57_v21, %v1461_v46  ;;  %v161_v50 = vsub.f32 %v54_v27, %v1464_v47 }
  0x1f   :  { %v322_v43 = vpack.c.bf16 %v252_v30, %v247_v26  ;;  %v251_v44 = vmul.f32 %v1479_v52, %v144_v32  ;;  %v155_v57 = vsub.f32 %v48_v34, %v1444_v41  ;;  %v162_v26 = vsub.f32 %v55_v11, %v1458_v45  ;;  %v63_v32 = vld [vmem:[%s2013_s0 + $0x148] sm:$0xff]  ;;  %v78_v11 = vld [vmem:[%s2013_s0 + $0x1c0] sm:$0xff] }
  0x20   :  { %1071 = vmatpush3.bf16.msra.mxu0 %v1268_v36  ;;  %v246_v36 = vmul.f32 %v1479_v52, %v139_v28  ;;  %v59_v28 = vld [vmem:[%s2013_s0 + $0x128] sm:$0xff]  ;;  %v170_v56 = vsub.f32 %v63_v32, %v1444_v41  ;;  %v271_v61 = vmul.f32 %v1479_v52, %v164_v38  ;;  %v268_v62 = vmul.f32 %v1485_v54, %v161_v50 }
  0x21   :  { %1135 = vmatpush3.bf16.msra.mxu1 %v1269_v37  ;;  %1233 = vmatprep.subr.msk.bf16.mxu0 %vm683_vm0, %v1270_v0  ;;  %v141_v37 = vsub.f32 %v34_v23, %v1464_v47  ;;  %v262_v3 = vmul.f32 %v1467_v48, %v155_v57  ;;  %v1273_v34 = vld [vmem:[%s2016_s3 + $0x108] sm:$0xff]   ;;  %v166_v51 = vsub.f32 %v59_v28, %v1464_v47 }
  0x22   :  { %1234 = vmatprep.subr.msk.bf16.mxu1 %vm683_vm0, %v1270_v0  ;;  %v321_v59 = vpack.c.bf16 %v251_v44, %v246_v36  ;;  %v49_v0 = vld [vmem:[%s2013_s0 + $0xd8] sm:$0xff]  ;;  %v175_v57 = vsub.f32 %v68_v33, %v1444_v41  ;;  %v174_v17 = vsub.f32 %v67_v4, %v1461_v46 }
  0x23   :  { %720 = vmatmul.mubr.bf16.vlgmr.msra.gmra.mxu0 %v316_v19  ;;  %v248_v55 = vmul.f32 %v1485_v54, %v141_v37  ;;  %v327_v12 = vpack.c.bf16 %v262_v3, %v257_v2  ;;  %v156_v15 = vsub.f32 %v49_v0, %v1464_v47  ;;  %v261_v19 = vmul.f32 %v1479_v52, %v154_v9  ;;  %v62_v3 = vld [vmem:[%s2013_s0 + $0x140] sm:$0xff]  ;;  %v69_v9 = vld [vmem:[%s2013_s0 + $0x178] sm:$0xff] }
  0x24   :  { %817 = vmatmul.mubr.bf16.vlgmr.msra.gmra.mxu1 %v318_v20  ;;  %1198 = vmatpush3.bf16.msra.mxu0 %v685_v16  ;;  %v160_v20 = vsub.f32 %v53_v5, %v1444_v41  ;;  %v269_v37 = vmul.f32 %v1470_v49, %v162_v26  ;;  %v273_v63 = vmul.f32 %v1485_v54, %v166_v51  ;;  %v1274_v5 = vld [vmem:[%s2016_s3 + $0x100] sm:$0xff]  }
  0x25   :  { %1228 = vmatpush3.bf16.msra.mxu1 %v685_v16  ;;  %1199 = vmatprep.subr.bf16.mxu0 %v1271_v25  ;;  %v323_v6 = vpack.c.bf16 %v253_v60, %v248_v55  ;;  %v60_v16 = vld [vmem:[%s2013_s0 + $0x130] sm:$0xff]  ;;  %v263_v23 = vmul.f32 %v1485_v54, %v156_v15  ;;  %v326_v35 = vpack.c.bf16 %v261_v19, %v256_v13 }
  0x26   :  { %1224 = vmatprep.subr.bf16.mxu1 %v1271_v25  ;;  %727 = vmatprep.mubr.bf16.mxu0 %v322_v43  ;;  %v267_v29 = vmul.f32 %v1467_v48, %v160_v20  ;;  %v167_v30 = vsub.f32 %v60_v16, %v1458_v45  ;;  %v172_v60 = vsub.f32 %v65_v39, %v1458_v45  ;;  %v80_v13 = vld [vmem:[%s2013_s0 + $0x1d0] sm:$0xff] }
  0x27   :  { %824 = vmatprep.mubr.bf16.mxu1 %v324_v53  ;;  %v328_v43 = vpack.c.bf16 %v263_v23, %v258_v22  ;;  %v70_v53 = vld [vmem:[%s2013_s0 + $0x180] sm:$0xff]  ;;  %v282_v2 = vmul.f32 %v1467_v48, %v175_v57  ;;  %v333_v15 = vpack.c.bf16 %v273_v63, %v268_v62  ;;  %v169_v16 = vsub.f32 %v62_v3, %v1461_v46 }
  0x28   :  { %1200 = vmatpush3.bf16.msra.mxu0 %v1271_v25  ;;  %v274_v44 = vmul.f32 %v1470_v49, %v167_v30  ;;  %v177_v0 = vsub.f32 %v70_v53, %v1458_v45  ;;  %v171_v19 = vsub.f32 %v64_v8, %v1464_v47  ;;  %v176_v20 = vsub.f32 %v69_v9, %v1464_v47 }
  0x29   :  { %1229 = vmatpush3.bf16.msra.mxu1 %v1271_v25  ;;  %1201 = vmatprep.subr.bf16.mxu0 %v1272_v1  ;;  %v165_v25 = vsub.f32 %v58_v10, %v1444_v41  ;;  %v73_v10 = vld [vmem:[%s2013_s0 + $0x198] sm:$0xff]  ;;  %v185_v23 = vsub.f32 %v78_v11, %v1444_v41  ;;  %v187_v26 = vsub.f32 %v80_v13, %v1458_v45 }
  0x2a   :  { %1225 = vmatprep.subr.bf16.mxu1 %v1272_v1  ;;  %v334_v58 = vpack.c.bf16 %v274_v44, %v269_v37  ;;  %v284_v7 = vmul.f32 %v1470_v49, %v177_v0  ;;  %v180_v21 = vsub.f32 %v73_v10, %v1444_v41 }
  0x2b   :  { %728 = vmatmul.mubr.bf16.gmra.mxu0 %v321_v59  ;;  %v272_v36 = vmul.f32 %v1467_v48, %v165_v25  ;;  %v266_v59 = vmul.f32 %v1479_v52, %v159_v31 }
  0x2c   :  { %825 = vmatmul.mubr.bf16.gmra.mxu1 %v323_v6  ;;  %735 = vmatprep.mubr.bf16.mxu0 %v327_v12  ;;  %v279_v6 = vmul.f32 %v1470_v49, %v172_v60  ;;  %v75_v12 = vld [vmem:[%s2013_s0 + $0x1a8] sm:$0xff] }
  0x2d   :  { %832 = vmatprep.mubr.bf16.mxu1 %v329_v18  ;;  %1202 = vmatpush3.bf16.msra.mxu0 %v1272_v1  ;;  %v332_v55 = vpack.c.bf16 %v272_v36, %v267_v29  ;;  %v331_v14 = vpack.c.bf16 %v271_v61, %v266_v59  ;;  %v182_v25 = vsub.f32 %v75_v12, %v1458_v45 }
  0x2e   :  { %1230 = vmatpush3.bf16.msra.mxu1 %v1272_v1  ;;  %1203 = vmatprep.subr.bf16.mxu0 %v1273_v34  ;;  %v277_v1 = vmul.f32 %v1467_v48, %v170_v56  ;;  %v339_v22 = vpack.c.bf16 %v284_v7, %v279_v6 }
  0x2f   :  { %1226 = vmatprep.subr.bf16.mxu1 %v1273_v34 }
  0x30   :  { %v337_v18 = vpack.c.bf16 %v282_v2, %v277_v1 }
  0x31   :  { %1204 = vmatpush3.bf16.msra.mxu0 %v1273_v34 }
  0x32   :  { %1231 = vmatpush3.bf16.msra.mxu1 %v1273_v34  ;;  %1205 = vmatprep.subr.bf16.mxu0 %v1274_v5 }
  0x33   :  { %736 = vmatmul.mubr.bf16.gmra.mxu0 %v326_v35  ;;  %1227 = vmatprep.subr.bf16.mxu1 %v1274_v5 }
  0x34   :  { %833 = vmatmul.mubr.bf16.gmra.mxu1 %v328_v43  ;;  %743 = vmatprep.mubr.bf16.mxu0 %v332_v55 }
  0x35   :  { %840 = vmatprep.mubr.bf16.mxu1 %v334_v58  ;;  %1206 = vmatpush3.bf16.msra.mxu0 %v1274_v5 }
  0x36   :  { %10 = vsyncpa [#allocation3], 0  ;;  %v276_v27 = vmul.f32 %v1479_v52, %v169_v16  ;;  %v281_v28 = vmul.f32 %v1479_v52, %v174_v17  ;;  %1232 = vmatpush3.bf16.msra.mxu1 %v1274_v5  ;;  %v278_v29 = vmul.f32 %v1485_v54, %v171_v19  ;;  %v283_v30 = vmul.f32 %v1485_v54, %v176_v20  ;;  %v72_v32 = vld [vmem:[%s2013_s0 + $0x190] sm:$0xff]  ;;  %v77_v33 = vld [vmem:[%s2013_s0 + $0x1b8] sm:$0xff] }
  0x37   :  { %v287_v31 = vmul.f32 %v1467_v48, %v180_v21  ;;  %v74_v34 = vld [vmem:[%s2013_s0 + $0x1a0] sm:$0xff]  ;;  %v292_v35 = vmul.f32 %v1467_v48, %v185_v23  ;;  %v289_v36 = vmul.f32 %v1470_v49, %v182_v25  ;;  %v294_v37 = vmul.f32 %v1470_v49, %v187_v26  ;;  %v79_v38 = vld [vmem:[%s2013_s0 + $0x1c8] sm:$0xff]  ;;  %v88_v43 = vld [vmem:[%s2013_s0 + $0x210] sm:$0xff] }
  0x38   :  { %v83_v39 = vld [vmem:[%s2013_s0 + $0x1e8] sm:$0xff]  ;;  %v85_v44 = vld [vmem:[%s2013_s0 + $0x1f8] sm:$0xff]  ;;  %v90_v50 = vld [vmem:[%s2013_s0 + $0x220] sm:$0xff]  ;;  %v336_v51 = vpack.c.bf16 %v281_v28, %v276_v27  ;;  %v179_v53 = vsub.f32 %v72_v32, %v1461_v46  ;;  %v184_v55 = vsub.f32 %v77_v33, %v1461_v46  ;;  %v181_v56 = vsub.f32 %v74_v34, %v1464_v47 }
  0x39   :  { %v338_v57 = vpack.c.bf16 %v283_v30, %v278_v29  ;;  %v186_v58 = vsub.f32 %v79_v38, %v1464_v47  ;;  %v190_v59 = vsub.f32 %v83_v39, %v1444_v41  ;;  %v195_v60 = vsub.f32 %v88_v43, %v1444_v41  ;;  %v82_v4 = vld [vmem:[%s2013_s0 + $0x1e0] sm:$0xff]  ;;  %v87_v5 = vld [vmem:[%s2013_s0 + $0x208] sm:$0xff]  ;;  %v84_v9 = vld [vmem:[%s2013_s0 + $0x1f0] sm:$0xff] }
  0x3a   :  { %v342_v61 = vpack.c.bf16 %v292_v35, %v287_v31  ;;  %v344_v62 = vpack.c.bf16 %v294_v37, %v289_v36  ;;  %v192_v63 = vsub.f32 %v85_v44, %v1458_v45  ;;  %v197_v0 = vsub.f32 %v90_v50, %v1458_v45  ;;  %v89_v12 = vld [vmem:[%s2013_s0 + $0x218] sm:$0xff]  ;;  %v98_v16 = vld [vmem:[%s2013_s0 + $0x260] sm:$0xff]  ;;  %v95_v17 = vld [vmem:[%s2013_s0 + $0x248] sm:$0xff] }
  0x3b   :  { %744 = vmatmul.mubr.bf16.gmra.mxu0 %v331_v14  ;;  %v286_v1 = vmul.f32 %v1479_v52, %v179_v53  ;;  %v291_v2 = vmul.f32 %v1479_v52, %v184_v55  ;;  %v288_v3 = vmul.f32 %v1485_v54, %v181_v56  ;;  %v293_v6 = vmul.f32 %v1485_v54, %v186_v58  ;;  %v93_v13 = vld [vmem:[%s2013_s0 + $0x238] sm:$0xff]  ;;  %v94_v35 = vld [vmem:[%s2013_s0 + $0x240] sm:$0xff]  ;;  %v99_v36 = vld [vmem:[%s2013_s0 + $0x268] sm:$0xff] }
  0x3c   :  { %841 = vmatmul.mubr.bf16.gmra.mxu1 %v333_v15  ;;  %751 = vmatprep.mubr.bf16.mxu0 %v337_v18  ;;  %v297_v7 = vmul.f32 %v1467_v48, %v190_v59  ;;  %v302_v8 = vmul.f32 %v1467_v48, %v195_v60  ;;  %v299_v10 = vmul.f32 %v1470_v49, %v192_v63  ;;  %v100_v18 = vld [vmem:[%s2013_s0 + $0x270] sm:$0xff]  ;;  %v122_v21 = vsub.s32 4, %v1399_v24  ;;  %v26_v44 = vld [vmem:[%s2013_s0 + $0x20] sm:$0xff]  ;;  %v31_v50 = vld [vmem:[%s2013_s0 + $0x48] sm:$0xff] }
  0x3d   :  { %848 = vmatprep.mubr.bf16.mxu1 %v339_v22  ;;  %v304_v11 = vmul.f32 %v1470_v49, %v197_v0  ;;  %v189_v14 = vsub.f32 %v82_v4, %v1461_v46  ;;  %v194_v15 = vsub.f32 %v87_v5, %v1461_v46  ;;  %v341_v19 = vpack.c.bf16 %v291_v2, %v286_v1  ;;  %v92_v24 = vld [vmem:[%s2013_s0 + $0x230] sm:$0xff]  ;;  %v41_v5 = vld [vmem:[%s2013_s0 + $0x98] sm:$0xff] }
  0x3e   :  { %v191_v20 = vsub.f32 %v84_v9, %v1464_v47  ;;  %v343_v22 = vpack.c.bf16 %v293_v6, %v288_v3  ;;  %v347_v23 = vpack.c.bf16 %v302_v8, %v297_v7  ;;  %v196_v25 = vsub.f32 %v89_v12, %v1464_v47  ;;  %v36_v4 = vld [vmem:[%s2013_s0 + $0x70] sm:$0xff]  ;;  %v81_v7 = vld [vmem:[%s2013_s0 + $0x1d8] sm:$0xff]  ;;  %v46_v8 = vld [vmem:[%s2013_s0 + $0xc0] sm:$0xff] }
  0x3f   :  { %v200_v26 = vsub.f32 %v93_v13, %v1444_v41  ;;  %v349_v27 = vpack.c.bf16 %v304_v11, %v299_v10  ;;  %v205_v28 = vsub.f32 %v98_v16, %v1444_v41  ;;  %v202_v29 = vsub.f32 %v95_v17, %v1458_v45  ;;  %v76_v6 = vld [vmem:[%s2013_s0 + $0x1b0] sm:$0xff]  ;;  %v51_v9 = vld [vmem:[%s2013_s0 + $0xe8] sm:$0xff]  ;;  %v86_v10 = vld [vmem:[%s2013_s0 + $0x200] sm:$0xff] }
  0x40   :  { %v207_v30 = vsub.f32 %v100_v18, %v1458_v45  ;;  %v296_v31 = vmul.f32 %v1479_v52, %v189_v14  ;;  %v301_v32 = vmul.f32 %v1479_v52, %v194_v15  ;;  %v298_v33 = vmul.f32 %v1485_v54, %v191_v20  ;;  %v97_v45 = vld [vmem:[%s2013_s0 + $0x258] sm:$0xff]  ;;  %v91_v11 = vld [vmem:[%s2013_s0 + $0x228] sm:$0xff] }
  0x41   :  { %v303_v34 = vmul.f32 %v1485_v54, %v196_v25  ;;  %v307_v41 = vmul.f32 %v1467_v48, %v200_v26  ;;  %v1795_v37 = vrot.slane %v1441_v40, %v122_v21  ;;  %v312_v38 = vmul.f32 %v1467_v48, %v205_v28  ;;  %v66_v40 = vld [vmem:[%s2013_s0 + $0x160] sm:$0xff]  ;;  %v71_v48 = vld [vmem:[%s2013_s0 + $0x188] sm:$0xff] }
  0x42   :  { %v309_v39 = vmul.f32 %v1470_v49, %v202_v29  ;;  %v314_v43 = vmul.f32 %v1470_v49, %v207_v30  ;;  %v199_v53 = vsub.f32 %v92_v24, %v1461_v46  ;;  %v204_v49 = vsub.f32 %v97_v45, %v1461_v46  ;;  %v56_v30 = vld [vmem:[%s2013_s0 + $0x110] sm:$0xff]  ;;  %v61_v24 = vld [vmem:[%s2013_s0 + $0x138] sm:$0xff] }
  0x43   :  { %752 = vmatmul.mubr.bf16.gmra.mxu0 %v336_v51  ;;  %v346_v51 = vpack.c.bf16 %v301_v32, %v296_v31  ;;  %v201_v55 = vsub.f32 %v94_v35, %v1464_v47  ;;  %v206_v56 = vsub.f32 %v99_v36, %v1464_v47  ;;  %v133_v58 = vsub.f32 %v26_v44, %v1795_v37 }
  0x44   :  { %849 = vmatmul.mubr.bf16.gmra.mxu1 %v338_v57  ;;  %759 = vmatprep.mubr.bf16.mxu0 %v342_v61  ;;  %v348_v57 = vpack.c.bf16 %v303_v34, %v298_v33  ;;  %v138_v59 = vsub.f32 %v31_v50, %v1795_v37  ;;  %v1819_v60 = vrot.slane %v1449_v42, %v122_v21  ;;  %vm658_vm1 = vcmask 621568   ;;  %v96_v34 = vld [vmem:[%s2013_s0 + $0x250] sm:$0xff] }
  0x45   :  { %856 = vmatprep.mubr.bf16.mxu1 %v344_v62  ;;  %v352_v61 = vpack.c.bf16 %v312_v38, %v307_v41  ;;  %v354_v62 = vpack.c.bf16 %v314_v43, %v309_v39  ;;  %v173_v63 = vsub.f32 %v66_v40, %v1795_v37  ;;  %v178_v0 = vsub.f32 %v71_v48, %v1795_v37  ;;  %v101_v41 = vld [vmem:[%s2013_s0 + $0x278] sm:$0xff] }
  0x46   :  { %v306_v46 = vmul.f32 %v1479_v52, %v199_v53  ;;  %v311_v1 = vmul.f32 %v1479_v52, %v204_v49  ;;  %v308_v47 = vmul.f32 %v1485_v54, %v201_v55  ;;  %v313_v2 = vmul.f32 %v1485_v54, %v206_v56 }
  0x47   :  { %v240_v3 = vmul.f32 %v1819_v60, %v133_v58  ;;  %v245_v42 = vmul.f32 %v1819_v60, %v138_v59  ;;  %v280_v52 = vmul.f32 %v1819_v60, %v173_v63  ;;  %v285_v54 = vmul.f32 %v1819_v60, %v178_v0 }
  0x48   :  { %v351_v12 = vpack.c.bf16 %v311_v1, %v306_v46  ;;  %v353_v13 = vpack.c.bf16 %v313_v2, %v308_v47  ;;  %v143_v14 = vsub.f32 %v36_v4, %v1795_v37  ;;  %v148_v15 = vsub.f32 %v41_v5, %v1795_v37 }
  0x49   :  { %v320_v16 = vpack.c.bf16 %v245_v42, %v240_v3  ;;  %v183_v17 = vsub.f32 %v76_v6, %v1795_v37  ;;  %v188_v18 = vsub.f32 %v81_v7, %v1795_v37  ;;  %v340_v20 = vpack.c.bf16 %v285_v54, %v280_v52 }
  0x4a   :  { %v158_v21 = vsub.f32 %v51_v9, %v1795_v37  ;;  %v250_v25 = vmul.f32 %v1819_v60, %v143_v14  ;;  %v255_v26 = vmul.f32 %v1819_v60, %v148_v15  ;;  %v163_v35 = vsub.f32 %v56_v30, %v1795_v37 }
  0x4b   :  { %760 = vmatmul.mubr.bf16.gmra.mxu0 %v341_v19  ;;  %v153_v19 = vsub.f32 %v46_v8, %v1795_v37  ;;  %v295_v28 = vmul.f32 %v1819_v60, %v188_v18  ;;  %v168_v38 = vsub.f32 %v61_v24, %v1795_v37  ;;  %v203_v39 = vsub.f32 %v96_v34, %v1795_v37 }
  0x4c   :  { %857 = vmatmul.mubr.bf16.gmra.mxu1 %v343_v22  ;;  %767 = vmatprep.mubr.bf16.mxu0 %v347_v23  ;;  %v193_v22 = vsub.f32 %v86_v10, %v1795_v37  ;;  %v198_v23 = vsub.f32 %v91_v11, %v1795_v37  ;;  %v265_v31 = vmul.f32 %v1819_v60, %v158_v21 }
  0x4d   :  { %864 = vmatprep.mubr.bf16.mxu1 %v349_v27  ;;  %v290_v27 = vmul.f32 %v1819_v60, %v183_v17  ;;  %v260_v29 = vmul.f32 %v1819_v60, %v153_v19  ;;  %v325_v45 = vpack.c.bf16 %v255_v26, %v250_v25  ;;  %v208_v43 = vsub.f32 %v101_v41, %v1795_v37 }
  0x4e   :  { %v300_v32 = vmul.f32 %v1819_v60, %v193_v22  ;;  %v305_v33 = vmul.f32 %v1819_v60, %v198_v23  ;;  %v275_v40 = vmul.f32 %v1819_v60, %v168_v38  ;;  %v310_v48 = vmul.f32 %v1819_v60, %v203_v39 }
  0x4f   :  { %v345_v36 = vpack.c.bf16 %v295_v28, %v290_v27  ;;  %v330_v44 = vpack.c.bf16 %v265_v31, %v260_v29  ;;  %v315_v53 = vmul.f32 %v1819_v60, %v208_v43  ;;  %v1956_v43 = vld [vmem:[%s2017_s4] ss:$0 sm:$0xff]  ;;  %s1297_s4 = smov [#allocation2]  }
  0x50   :  { %v350_v50 = vpack.c.bf16 %v305_v33, %v300_v32  ;;  %s999_s17 = sshll.u32 %s1297_s4, 4  ;;  %s1000_s17 = int_to_ptr.vmem [resolvable:$true] %s999_s17 }
  0x51   :  { %v355_v37 = vpack.c.bf16 %v315_v53, %v310_v48  ;;  %s1275_s18 = scalar_lea.vmem %s1000_s17, 2048  ;;  %p1280_p1 = scmp.lt.s32.totalorder %s1000_s17, %s1000_s17 }
  0x52   :  { %p1276_p0 = scmp.ne.s32.totalorder %s1000_s17, %s1275_s18  ;;  %p1281_p2 = scmp.lt.s32.totalorder %s1275_s18, %s1275_s18 }
  0x53   :  { %768 = vmatmul.mubr.bf16.gmra.mxu0 %v346_v51  ;;  %v270_v51 = vmul.f32 %v1819_v60, %v163_v35 }
  0x54   :  { %865 = vmatmul.mubr.bf16.gmra.mxu1 %v348_v57  ;;  %775 = vmatprep.mubr.bf16.mxu0 %v352_v61  ;;  %p1282_p3 = por %p1281_p2, %p1280_p1 }
  0x55   :  { %872 = vmatprep.mubr.bf16.mxu1 %v354_v62  ;;  %v335_v49 = vpack.c.bf16 %v275_v40, %v270_v51 }
  0x56   :  { %p1283_p4 = pnand %p1282_p3, %p1276_p0 }
  0x5b   :  { %776 = vmatmul.mubr.bf16.gmra.mxu0 %v351_v12 }
  0x5c   :  { %873 = vmatmul.mubr.bf16.gmra.mxu1 %v353_v13  ;;  %1207 = vmatprep.mubr.msk.bf16.mxu0 %vm658_vm1, %v320_v16 }
  0x5d   :  { %1215 = vmatprep.mubr.msk.bf16.mxu1 %vm658_vm1, %v340_v20 }
  0x63   :  { %1208 = vmatmul.mubr.msk.bf16.vlgmr.msra.gmra.mxu0 %vm658_vm1, %v325_v45 }
  0x64   :  { %1216 = vmatmul.mubr.msk.bf16.vlgmr.msra.gmra.mxu1 %vm658_vm1, %v345_v36  ;;  %1211 = vmatprep.mubr.msk.bf16.mxu0 %vm658_vm1, %v330_v44 }
  0x65   :  { %1219 = vmatprep.mubr.msk.bf16.mxu1 %vm658_vm1, %v350_v50 }
  0x6b   :  { %1212 = vmatmul.mubr.msk.bf16.gmra.mxu0 %vm658_vm1, %v335_v49 }
  0x6c   :  { %1220 = vmatmul.mubr.msk.bf16.gmra.mxu1 %vm658_vm1, %v355_v37 }
  0xe3   :  { %v1072_v55 = vpop.f32.mrf.mxu0 }
  0xe4   :  { %v1899_v56 = vpop.f32.mrf.mxu1 }
  0xe5   :  { %v1073_v57 = vpop.f32.mrf.mxu0 }
  0xe6   :  { %v1901_v58 = vpop.f32.mrf.mxu1  ;;  %v1074_v36 = vadd.f32 %v1073_v57, %v1072_v55 }
  0xe7   :  { %v1075_v59 = vpop.f32.mrf.mxu0 }
  0xe8   :  { %v1903_v61 = vpop.f32.mrf.mxu1  ;;  %v722_v53 = vadd.f32 %v1074_v36, %v1956_v43 }
  0xe9   :  { %v1076_v60 = vpop.f32.mrf.mxu0 }
  0xea   :  { %v1905_v62 = vpop.f32.mrf.mxu1  ;;  %v1077_v44 = vadd.f32 %v1076_v60, %v1075_v59 }
  0xeb   :  { %v1078_v63 = vpop.f32.mrf.mxu0 }
  0xec   :  { %v1907_v0 = vpop.f32.mrf.mxu1 }
  0xed   :  { %v1079_v46 = vpop.f32.mrf.mxu0 }
  0xee   :  { %v1909_v1 = vpop.f32.mrf.mxu1  ;;  %v1080_v40 = vadd.f32 %v1079_v46, %v1078_v63  ;;  %v1141_v63 = vadd.f32 %v1905_v62, %v1903_v61 }
  0xef   :  { %v1081_v47 = vpop.f32.mrf.mxu0 }
  0xf0   :  { %v1911_v2 = vpop.f32.mrf.mxu1  ;;  %v730_v60 = vadd.f32 %v1080_v40, %v1956_v43 }
  0xf1   :  { %v1082_v3 = vpop.f32.mrf.mxu0 }
  0xf2   :  { %v1913_v42 = vpop.f32.mrf.mxu1  ;;  %v1083_v49 = vadd.f32 %v1082_v3, %v1081_v47 }
  0xf3   :  { %v1915_v4 = vpop.f32.mrf.mxu0 }
  0xf4   :  { %v1917_v5 = vpop.f32.mrf.mxu1  ;;  %v733_v46 = vadd.f32 %v1083_v49, %v1956_v43 }
  0xf5   :  { %v1085_v52 = vpop.f32.mrf.mxu0 }
  0xf6   :  { %v1919_v54 = vpop.f32.mrf.mxu1 }
  0xf7   :  { %v1921_v6 = vpop.f32.mrf.mxu0 }
  0xf8   :  { %v1923_v7 = vpop.f32.mrf.mxu1 }
  0xf9   :  { %2019 = vst [vmem:[#allocation5_spill] sm:$0xff] %v1923_v7  ;;  %v1925_v8 = vpop.f32.mrf.mxu0 }
  0xfa   :  { %v1927_v9 = vpop.f32.mrf.mxu1 }
  0xfb   :  { %2020 = vst [vmem:[#allocation6_spill] sm:$0xff] %v1927_v9  ;;  %v1090_v10 = vpop.f32.mrf.mxu0  ;;  %v725_v9 = vadd.f32 %v1077_v44, %v1956_v43 }
  0xfc   :  { %v1929_v11 = vpop.f32.mrf.mxu1 }
  0xfd   :  { %v1091_v12 = vpop.f32.mrf.mxu0 }
  0xfe   :  { %v1931_v13 = vpop.f32.mrf.mxu1 }
  0xff   :  { %v1933_v14 = vpop.f32.mrf.mxu0 }
 0x100   :  { %v1935_v15 = vpop.f32.mrf.mxu1 }
 0x101   :  { %v1937_v16 = vpop.f32.mrf.mxu0 }
 0x102   :  { %v1939_v17 = vpop.f32.mrf.mxu1 }
 0x103   :  { %2021 = vst [vmem:[#allocation7_spill] sm:$0xff] %v1939_v17  ;;  %v1096_v18 = vpop.f32.mrf.mxu0 }
 0x104   :  { %v1160_v19 = vpop.f32.mrf.mxu1 }
 0x105   :  { %v1097_v20 = vpop.f32.mrf.mxu0 }
 0x106   :  { %v1161_v21 = vpop.f32.mrf.mxu1  ;;  %v1098_v57 = vadd.f32 %v1097_v20, %v1096_v18 }
 0x107   :  { %v1099_v22 = vpop.f32.mrf.mxu0  ;;  %v1162_v36 = vadd.f32 %v1161_v21, %v1160_v19 }
 0x108   :  { %v1941_v23 = vpop.f32.mrf.mxu1 }
 0x109   :  { %v1100_v25 = vpop.f32.mrf.mxu0 }
 0x10a   :  { %v1943_v26 = vpop.f32.mrf.mxu1  ;;  %v1101_v47 = vadd.f32 %v1100_v25, %v1099_v22  ;;  %v822_v25 = vadd.f32 %v1141_v63, %v725_v9  ;;  %v1095_v9 = vadd.f32 %v1937_v16, %v1933_v14  ;;  %v1150_v63 = vadd.f32 %v1919_v54, %v1917_v5 }
 0x10b   :  { %v1102_v27 = vpop.f32.mrf.mxu0 }
 0x10c   :  { %v1166_v28 = vpop.f32.mrf.mxu1 }
 0x10d   :  { %v1103_v29 = vpop.f32.mrf.mxu0 }
 0x10e   :  { %v1167_v30 = vpop.f32.mrf.mxu1  ;;  %v1104_v48 = vadd.f32 %v1103_v29, %v1102_v27  ;;  %v754_v27 = vadd.f32 %v1098_v57, %v1956_v43 }
 0x10f   :  { %v1105_v31 = vpop.f32.mrf.mxu0  ;;  %v1168_v29 = vadd.f32 %v1167_v30, %v1166_v28 }
 0x110   :  { %v1169_v32 = vpop.f32.mrf.mxu1 }
 0x111   :  { %v1106_v33 = vpop.f32.mrf.mxu0 }
 0x112   :  { %v1170_v24 = vpop.f32.mrf.mxu1  ;;  %v1107_v7 = vadd.f32 %v1106_v33, %v1105_v31  ;;  %v1147_v31 = vadd.f32 %v1913_v42, %v1911_v2  ;;  %v1092_v33 = vadd.f32 %v1091_v12, %v1090_v10  ;;  %v851_v10 = vadd.f32 %v1162_v36, %v754_v27 }
 0x113   :  { %v1108_v34 = vpop.f32.mrf.mxu0  ;;  %v1165_v12 = vadd.f32 %v1943_v26, %v1941_v23 }
 0x114   :  { %v1945_v41 = vpop.f32.mrf.mxu1  ;;  %v765_v61 = vadd.f32 %v1107_v7, %v1956_v43  ;;  %v830_v28 = vadd.f32 %v1147_v31, %v733_v46  ;;  %v746_v7 = vadd.f32 %v1092_v33, %v1956_v43  ;;  %v2025_v31 = vld [vmem:[#allocation5_spill] sm:$0xff]  ;;  %v2026_v33 = vld [vmem:[#allocation6_spill] sm:$0xff] }
 0x115   :  { %v1109_v45 = vpop.f32.mrf.mxu0 }
 0x116   :  { %v1947_v35 = vpop.f32.mrf.mxu1 }
 0x117   :  { %v1949_v38 = vpop.f32.mrf.mxu0 }
 0x118   :  { %v1951_v39 = vpop.f32.mrf.mxu1 }
 0x119   :  { %2022 = vst [vmem:[#allocation8_spill] sm:$0xff] %v1951_v39  ;;  %v1958_v50 = vpop.f32.mrf.mxu0  ;;  %v1138_v39 = vadd.f32 %v1901_v58, %v1899_v56  ;;  %v1144_v56 = vadd.f32 %v1909_v1, %v1907_v0  ;;  %v1086_v58 = vadd.f32 %v1085_v52, %v1915_v4  ;;  %v757_v0 = vadd.f32 %v1101_v47, %v1956_v43 }
 0x11a   :  { %v1960_v51 = vpop.f32.mrf.mxu1  ;;  %v1171_v1 = vadd.f32 %v1170_v24, %v1169_v32  ;;  %v1110_v4 = vadd.f32 %v1109_v45, %v1108_v34  ;;  %v1113_v49 = vadd.f32 %v1958_v50, %v1949_v38 }
 0x11b   :  { %2023 = vst [vmem:[#allocation9_spill] sm:$0xff] %v1960_v51  ;;  %v1114_v37 = vpop.f32.mrf.mxu0  ;;  %v762_v51 = vadd.f32 %v1104_v48, %v1956_v43  ;;  %v819_v20 = vadd.f32 %v1138_v39, %v722_v53  ;;  %v827_v39 = vadd.f32 %v1144_v56, %v730_v60  ;;  %v738_v30 = vadd.f32 %v1086_v58, %v1956_v43 }
 0x11c   :  { %v1178_v55 = vpop.f32.mrf.mxu1  ;;  %v862_v21 = vadd.f32 %v1171_v1, %v765_v61  ;;  %v1156_v53 = vadd.f32 %v1931_v13, %v1929_v11  ;;  %v770_v14 = vadd.f32 %v1110_v4, %v1956_v43  ;;  %v854_v26 = vadd.f32 %v1165_v12, %v757_v0 }
 0x11d   :  { %v1115_v17 = vpop.f32.mrf.mxu0  ;;  %v859_v40 = vadd.f32 %v1168_v29, %v762_v51  ;;  %v1089_v51 = vadd.f32 %v1925_v8, %v1921_v6  ;;  %v749_v6 = vadd.f32 %v1095_v9, %v1956_v43  ;;  %v1174_v8 = vadd.f32 %v1947_v35, %v1945_v41 }
 0x11e   :  { %v1179_v59 = vpop.f32.mrf.mxu1  ;;  %v1116_v44 = vadd.f32 %v1115_v17, %v1114_v37  ;;  %v843_v46 = vadd.f32 %v1156_v53, %v746_v7  ;;  %v835_v56 = vadd.f32 %v1150_v63, %v738_v30  ;;  %v773_v41 = vadd.f32 %v1113_v49, %v1956_v43 }
 0x11f   :  { %v1117_v3 = vpop.f32.mrf.mxu0  ;;  %v1180_v37 = vadd.f32 %v1179_v59, %v1178_v55  ;;  %v741_v59 = vadd.f32 %v1089_v51, %v1956_v43  ;;  %v867_v58 = vadd.f32 %v1174_v8, %v770_v14  ;;  %v1153_v61 = vadd.f32 %v2026_v33, %v2025_v31 }
 0x120   :  { %v1971_v18 = vpop.f32.mrf.mxu1  ;;  %v778_v32 = vadd.f32 %v1116_v44, %v1956_v43  ;;  %v2027_v44 = vld [vmem:[#allocation8_spill] sm:$0xff] }
 0x121   :  { %v1118_v62 = vpop.f32.mrf.mxu0 }
 0x122   :  { %v1182_v22 = vpop.f32.mrf.mxu1  ;;  %v1119_v24 = vadd.f32 %v1118_v62, %v1117_v3  ;;  %v875_v55 = vadd.f32 %v1180_v37, %v778_v32  ;;  %v2024_v3 = vld [vmem:[#allocation7_spill] sm:$0xff] }
 0x123   :  { %v1209_v52 = vpop.f32.mrf.mxu0  ;;  %v1159_v5 = vadd.f32 %v2024_v3, %v1935_v15  ;;  %v1183_v35 = vadd.f32 %v1182_v22, %v1971_v18  ;;  %v2028_v15 = vld [vmem:[#allocation9_spill] sm:$0xff] }
 0x124   :  { %v1217_v48 = vpop.f32.mrf.mxu1  ;;  %v924_v2 = vadd.f32 %v1209_v52, %v827_v39  ;;  %v781_v47 = vadd.f32 %v1119_v24, %v1956_v43  ;;  %v1177_v39 = vadd.f32 %v2028_v15, %v2027_v44  ;;  %v838_v52 = vadd.f32 %v1153_v61, %v741_v59 }
 0x125   :  { %v956_v42 = vadd.f32 %v1217_v48, %v859_v40  ;;  %v915_v17 = vpop.f32.mrf.mxu0  ;;  %v846_v36 = vadd.f32 %v1159_v5, %v749_v6 }
 0x126   :  { %v947_v19 = vpop.f32.mrf.mxu1  ;;  %980 = vst [vmem:[#allocation2 + $0x10] sm:$0xff] %v924_v2  ;;  %v916_v34 = vadd.f32 %v915_v17, %v819_v20  ;;  %v878_v43 = vadd.f32 %v1183_v35, %v781_v47  ;;  %v870_v48 = vadd.f32 %v1177_v39, %v773_v41 }
 0x127   :  { %988 = vst [vmem:[#allocation2 + $0x50] sm:$0xff] %v956_v42  ;;  %v948_v45 = vadd.f32 %v947_v19, %v851_v10  ;;  %v1210_v16 = vpop.f32.mrf.mxu0 }
 0x128   :  { %v1218_v23 = vpop.f32.mrf.mxu1  ;;  %978 = vst [vmem:[#allocation2] sm:$0xff] %v916_v34  ;;  %v927_v57 = vadd.f32 %v1210_v16, %v830_v28 }
 0x129   :  { %986 = vst [vmem:[#allocation2 + $0x40] sm:$0xff] %v948_v45  ;;  %v959_v60 = vadd.f32 %v1218_v23, %v862_v21  ;;  %v918_v11 = vpop.f32.mrf.mxu0 }
 0x12a   :  { %v950_v13 = vpop.f32.mrf.mxu1  ;;  %981 = vst [vmem:[#allocation2 + $0x18] sm:$0xff] %v927_v57  ;;  %v919_v38 = vadd.f32 %v918_v11, %v822_v25 }
 0x12b   :  { %989 = vst [vmem:[#allocation2 + $0x58] sm:$0xff] %v959_v60  ;;  %v951_v50 = vadd.f32 %v950_v13, %v854_v26  ;;  %v1213_v54 = vpop.f32.mrf.mxu0 }
 0x12c   :  { %v1221_v20 = vpop.f32.mrf.mxu1  ;;  %979 = vst [vmem:[#allocation2 + $0x8] sm:$0xff] %v919_v38  ;;  %v940_v27 = vadd.f32 %v1213_v54, %v843_v46 }
 0x12d   :  { %987 = vst [vmem:[#allocation2 + $0x48] sm:$0xff] %v951_v50  ;;  %v972_v29 = vadd.f32 %v1221_v20, %v875_v55  ;;  %v931_v62 = vpop.f32.mrf.mxu0 }
 0x12e   :  { %v963_v25 = vpop.f32.mrf.mxu1  ;;  %984 = vst [vmem:[#allocation2 + $0x30] sm:$0xff] %v940_v27  ;;  %v932_v40 = vadd.f32 %v931_v62, %v835_v56 }
 0x12f   :  { %992 = vst [vmem:[#allocation2 + $0x70] sm:$0xff] %v972_v29  ;;  %v964_v0 = vadd.f32 %v963_v25, %v867_v58  ;;  %v1214_v18 = vpop.f32.mrf.mxu0 }
 0x130   :  { %v1222_v22 = vpop.f32.mrf.mxu1  ;;  %982 = vst [vmem:[#allocation2 + $0x20] sm:$0xff] %v932_v40  ;;  %v943_v1 = vadd.f32 %v1214_v18, %v846_v36 }
 0x131   :  { %990 = vst [vmem:[#allocation2 + $0x60] sm:$0xff] %v964_v0  ;;  %v975_v4 = vadd.f32 %v1222_v22, %v878_v43  ;;  %v934_v28 = vpop.f32.mrf.mxu0 }
 0x132   :  { %v966_v30 = vpop.f32.mrf.mxu1  ;;  %985 = vst [vmem:[#allocation2 + $0x38] sm:$0xff] %v943_v1  ;;  %v935_v2 = vadd.f32 %v934_v28, %v838_v52 }
 0x133   :  { %993 = vst [vmem:[#allocation2 + $0x78] sm:$0xff] %v975_v4  ;;  %v967_v42 = vadd.f32 %v966_v30, %v870_v48 }
 0x134   :  { %983 = vst [vmem:[#allocation2 + $0x28] sm:$0xff] %v935_v2 }
 0x135   :  { %991 = vst [vmem:[#allocation2 + $0x68] sm:$0xff] %v967_v42 }
 0x136   :  { %1286 = shalt.err (!%p1283_p4)
}
 0x137   :  { %s1298_s1 = smov 128   ;;  %s1299_s2 = smov 8  }
 0x138   :  { %1005 = dma.vmem_to_hbm [thread:$0]  %s1000_s17, 2048, %s2018_s5, [#allocation3], %s1298_s1, %s1298_s1, %s1299_s2  }
 0x139   :  { %1295 = dma.done.wait [#allocation3], 2048  }
 0x13a   :  { %1296 = vsyncadd [#allocation3], 4294965248 }
 0x13b   :  { %1009 = vsyncpa [#allocation3], 1 }

</bundles_post_ra>
